<compile_context>
chip_gen: v7x
topology: tpu7x:2x2x1
jax: 0.10.0
libtpu: 0.0.40
codegen_flags: <defaults>
</compile_context>

<pallas_src>
import functools

import jax
import jax.numpy as jnp
from jax.experimental import pallas as pl
from jax.experimental.pallas import tpu as pltpu


HIDDEN = 128
LN_EPS = 1e-5          # torch.nn.LayerNorm default eps
LEAKY_SLOPE = 0.1      # nn.LeakyReLU(0.1)
MAX_BATCH_TILE = 1024  # safe on v5e/v6e/v7x VMEM budgets (double-buffered)


def _leaky_ln(h, gamma, beta):
    """LeakyReLU(0.1) followed by LayerNorm over the last dim, all in f32.

    Variance computed as E[h^2] - mu^2 so the two cross-lane reductions can
    issue concurrently (no VPU pass sandwiched between dependent reductions).
    """
    h = jnp.where(h > 0, h, LEAKY_SLOPE * h)
    mu = jnp.mean(h, axis=-1, keepdims=True)
    mu2 = jnp.mean(h * h, axis=-1, keepdims=True)
    var = mu2 - mu * mu
    return (h - mu) * jax.lax.rsqrt(var + LN_EPS) * gamma + beta


def advantage_net_kernel(
    x_ref,
    w1_ref, b1_ref, g1_ref, be1_ref,
    w2_ref, b2_ref, g2_ref, be2_ref,
    w3_ref, b3_ref, g3_ref, be3_ref,
    w4_ref, b4_ref, g4_ref, be4_ref,
    w5_ref, b5_ref,
    out_ref,
):
    """4 x (Linear + LeakyReLU + LayerNorm) + Linear head, per batch tile.

    x_ref and all weights are bf16 (MXU-native); accumulation and all
    elementwise / normalization math are f32.
    """
    # Block 1: Linear(obs, 128) -> LeakyReLU(0.1) -> LayerNorm(128)
    h = jnp.dot(x_ref[...], w1_ref[...],
                preferred_element_type=jnp.float32) + b1_ref[...]
    h = _leaky_ln(h, g1_ref[...], be1_ref[...])

    # Block 2
    h = jnp.dot(h.astype(jnp.bfloat16), w2_ref[...],
                preferred_element_type=jnp.float32) + b2_ref[...]
    h = _leaky_ln(h, g2_ref[...], be2_ref[...])

    # Block 3
    h = jnp.dot(h.astype(jnp.bfloat16), w3_ref[...],
                preferred_element_type=jnp.float32) + b3_ref[...]
    h = _leaky_ln(h, g3_ref[...], be3_ref[...])

    # Block 4
    h = jnp.dot(h.astype(jnp.bfloat16), w4_ref[...],
                preferred_element_type=jnp.float32) + b4_ref[...]
    h = _leaky_ln(h, g4_ref[...], be4_ref[...])

    # Output head: Linear(128, actions), zero-padded to 128 lanes
    out = jnp.dot(h.astype(jnp.bfloat16), w5_ref[...],
                  preferred_element_type=jnp.float32) + b5_ref[...]
    out_ref[...] = out.astype(out_ref.dtype)


def init_params(key, observation_space=64, actions_amount=5):
    """Deterministic parameter init mimicking the PyTorch __init__ distributions."""
    keys = jax.random.split(key, 5)

    def kaiming_uniform(k, fan_in, fan_out, a=LEAKY_SLOPE):
        # torch.nn.init.kaiming_uniform_(a=0.1): bound = sqrt(6/((1+a^2)*fan_in))
        bound = jnp.sqrt(6.0 / ((1.0 + a * a) * fan_in))
        return jax.random.uniform(
            k, (fan_in, fan_out), jnp.float32, minval=-bound, maxval=bound)

    def xavier_uniform(k, fan_in, fan_out):
        bound = jnp.sqrt(6.0 / (fan_in + fan_out))
        return jax.random.uniform(
            k, (fan_in, fan_out), jnp.float32, minval=-bound, maxval=bound)

    params = {}
    dims = [observation_space, HIDDEN, HIDDEN, HIDDEN, HIDDEN]
    for i in range(4):
        params[f"w{i+1}"] = kaiming_uniform(keys[i], dims[i], dims[i + 1])
        params[f"b{i+1}"] = jnp.zeros((1, dims[i + 1]), jnp.float32)
        params[f"g{i+1}"] = jnp.ones((1, dims[i + 1]), jnp.float32)   # LN weight
        params[f"be{i+1}"] = jnp.zeros((1, dims[i + 1]), jnp.float32)  # LN bias
    params["w5"] = xavier_uniform(keys[4], HIDDEN, actions_amount)
    params["b5"] = jnp.zeros((1, actions_amount), jnp.float32)
    return params


def prepare_params(params, actions_amount):
    """One-time param prep: bf16 weights + head zero-padded to 128 output lanes."""
    prepared = {}
    for i in range(1, 5):
        prepared[f"w{i}"] = params[f"w{i}"].astype(jnp.bfloat16)
        prepared[f"b{i}"] = params[f"b{i}"].astype(jnp.float32)
        prepared[f"g{i}"] = params[f"g{i}"].astype(jnp.float32)
        prepared[f"be{i}"] = params[f"be{i}"].astype(jnp.float32)
    w5p = jnp.zeros((HIDDEN, HIDDEN), jnp.float32).at[:, :actions_amount].set(
        params["w5"])
    b5p = jnp.zeros((1, HIDDEN), jnp.float32).at[:, :actions_amount].set(
        params["b5"])
    prepared["w5"] = w5p.astype(jnp.bfloat16)
    prepared["b5"] = b5p
    return prepared


@functools.partial(jax.jit, static_argnames=("actions_amount",))
def advantage_net_forward(x, prepared, actions_amount=5):
    B, obs = x.shape

    # Batch tile: multiple of 8 (f32 sublane), capped so VMEM stays bounded
    # on v7x's 64 MiB physical / 32 MiB scoped budget.
    if B >= MAX_BATCH_TILE:
        tb = MAX_BATCH_TILE
    else:
        tb = max(8, ((B + 7) // 8) * 8)
    b_pad = ((B + tb - 1) // tb) * tb

    x_bf = x.astype(jnp.bfloat16)
    if b_pad != B:
        x_bf = jnp.pad(x_bf, ((0, b_pad - B), (0, 0)))

    operands = [
        x_bf,
        prepared["w1"], prepared["b1"], prepared["g1"], prepared["be1"],
        prepared["w2"], prepared["b2"], prepared["g2"], prepared["be2"],
        prepared["w3"], prepared["b3"], prepared["g3"], prepared["be3"],
        prepared["w4"], prepared["b4"], prepared["g4"], prepared["be4"],
        prepared["w5"], prepared["b5"],
    ]

    def const_spec(shape):
        # Params: same block every grid step -> stay resident in VMEM.
        return pl.BlockSpec(shape, lambda i: (0,) * len(shape))

    in_specs = [pl.BlockSpec((tb, obs), lambda i: (i, 0))]
    in_specs += [const_spec(op.shape) for op in operands[1:]]

    out_padded = pl.pallas_call(
        advantage_net_kernel,
        out_shape=jax.ShapeDtypeStruct((b_pad, HIDDEN), jnp.float32),
        grid=(b_pad // tb,),
        in_specs=in_specs,
        out_specs=pl.BlockSpec((tb, HIDDEN), lambda i: (i, 0)),
        compiler_params=pltpu.CompilerParams(
            dimension_semantics=("parallel",)),
    )(*operands)

    return out_padded[:B, :actions_amount]


if __name__ == "__main__":
    observation_space = 64
    actions_amount = 5
    batch = 2

    key = jax.random.PRNGKey(0)
    k_params, k_x = jax.random.split(key)

    params = init_params(k_params, observation_space, actions_amount)
    prepared = prepare_params(params, actions_amount)
    x = jax.random.normal(k_x, (batch, observation_space), jnp.float32)

    out = advantage_net_forward(x, prepared, actions_amount=actions_amount)
    out = jax.block_until_ready(out)

    # Pure-JAX references: one matching the kernel's bf16-matmul arithmetic
    # (tight check), and the exact f32 PyTorch-equivalent forward (loose check,
    # tolerance consistent with bf16 matmul precision).
    def ref_forward(x, p, use_bf16):
        def cast(a):
            return a.astype(jnp.bfloat16) if use_bf16 else a
        h = x
        for i in range(1, 5):
            h = jnp.dot(cast(h), cast(p[f"w{i}"]),
                        preferred_element_type=jnp.float32) + p[f"b{i}"]
            h = jnp.where(h > 0, h, LEAKY_SLOPE * h)
            mu = jnp.mean(h, axis=-1, keepdims=True)
            var = jnp.mean((h - mu) ** 2, axis=-1, keepdims=True)
            h = (h - mu) / jnp.sqrt(var + LN_EPS) * p[f"g{i}"] + p[f"be{i}"]
        return jnp.dot(cast(h), cast(p["w5"]),
                       preferred_element_type=jnp.float32) + p["b5"]

    ref_bf16 = ref_forward(x, params, use_bf16=True)
    ref_f32 = ref_forward(x, params, use_bf16=False)

    assert out.shape == (batch, actions_amount), out.shape
    assert jnp.allclose(out, ref_bf16, atol=1e-2, rtol=1e-2), \
        float(jnp.max(jnp.abs(out - ref_bf16)))
    assert jnp.allclose(out, ref_f32, atol=5e-2, rtol=5e-2), \
        float(jnp.max(jnp.abs(out - ref_f32)))

    print("KERNEL_OK")
</pallas_src>

<mosaic_0001>
module attributes {stable_mosaic.version = 11 : i64} {
  func.func @advantage_net_kernel(%arg0: i32, %arg1: memref<8x64xbf16, #tpu.memory_space<vmem>>, %arg2: memref<64x128xbf16, #tpu.memory_space<vmem>>, %arg3: memref<1x128xf32, #tpu.memory_space<vmem>>, %arg4: memref<1x128xf32, #tpu.memory_space<vmem>>, %arg5: memref<1x128xf32, #tpu.memory_space<vmem>>, %arg6: memref<128x128xbf16, #tpu.memory_space<vmem>>, %arg7: memref<1x128xf32, #tpu.memory_space<vmem>>, %arg8: memref<1x128xf32, #tpu.memory_space<vmem>>, %arg9: memref<1x128xf32, #tpu.memory_space<vmem>>, %arg10: memref<128x128xbf16, #tpu.memory_space<vmem>>, %arg11: memref<1x128xf32, #tpu.memory_space<vmem>>, %arg12: memref<1x128xf32, #tpu.memory_space<vmem>>, %arg13: memref<1x128xf32, #tpu.memory_space<vmem>>, %arg14: memref<128x128xbf16, #tpu.memory_space<vmem>>, %arg15: memref<1x128xf32, #tpu.memory_space<vmem>>, %arg16: memref<1x128xf32, #tpu.memory_space<vmem>>, %arg17: memref<1x128xf32, #tpu.memory_space<vmem>>, %arg18: memref<128x128xbf16, #tpu.memory_space<vmem>>, %arg19: memref<1x128xf32, #tpu.memory_space<vmem>>, %arg20: memref<8x128xf32, #tpu.memory_space<vmem>>) attributes {dimension_semantics = [#tpu.dimension_semantics<parallel>], iteration_bounds = array<i64: 1>, scalar_prefetch = 0 : i64, scratch_operands = 0 : i64, tpu.core_type = #tpu.core_type<tc>, window_params = [{transform_indices = @transform_0, window_bounds = array<i64: 8, 64>}, {pipeline_mode = #tpu.pipeline_mode<synchronous>, transform_indices = @transform_1, window_bounds = array<i64: 64, 128>}, {pipeline_mode = #tpu.pipeline_mode<synchronous>, transform_indices = @transform_2, window_bounds = array<i64: 1, 128>}, {pipeline_mode = #tpu.pipeline_mode<synchronous>, transform_indices = @transform_3, window_bounds = array<i64: 1, 128>}, {pipeline_mode = #tpu.pipeline_mode<synchronous>, transform_indices = @transform_4, window_bounds = array<i64: 1, 128>}, {pipeline_mode = #tpu.pipeline_mode<synchronous>, transform_indices = @transform_5, window_bounds = array<i64: 128, 128>}, {pipeline_mode = #tpu.pipeline_mode<synchronous>, transform_indices = @transform_6, window_bounds = array<i64: 1, 128>}, {pipeline_mode = #tpu.pipeline_mode<synchronous>, transform_indices = @transform_7, window_bounds = array<i64: 1, 128>}, {pipeline_mode = #tpu.pipeline_mode<synchronous>, transform_indices = @transform_8, window_bounds = array<i64: 1, 128>}, {pipeline_mode = #tpu.pipeline_mode<synchronous>, transform_indices = @transform_9, window_bounds = array<i64: 128, 128>}, {pipeline_mode = #tpu.pipeline_mode<synchronous>, transform_indices = @transform_10, window_bounds = array<i64: 1, 128>}, {pipeline_mode = #tpu.pipeline_mode<synchronous>, transform_indices = @transform_11, window_bounds = array<i64: 1, 128>}, {pipeline_mode = #tpu.pipeline_mode<synchronous>, transform_indices = @transform_12, window_bounds = array<i64: 1, 128>}, {pipeline_mode = #tpu.pipeline_mode<synchronous>, transform_indices = @transform_13, window_bounds = array<i64: 128, 128>}, {pipeline_mode = #tpu.pipeline_mode<synchronous>, transform_indices = @transform_14, window_bounds = array<i64: 1, 128>}, {pipeline_mode = #tpu.pipeline_mode<synchronous>, transform_indices = @transform_15, window_bounds = array<i64: 1, 128>}, {pipeline_mode = #tpu.pipeline_mode<synchronous>, transform_indices = @transform_16, window_bounds = array<i64: 1, 128>}, {pipeline_mode = #tpu.pipeline_mode<synchronous>, transform_indices = @transform_17, window_bounds = array<i64: 128, 128>}, {pipeline_mode = #tpu.pipeline_mode<synchronous>, transform_indices = @transform_18, window_bounds = array<i64: 1, 128>}, {transform_indices = @transform_19, window_bounds = array<i64: 8, 128>}]} {
    %c0 = arith.constant 0 : index
    %c0_0 = arith.constant 0 : index
    %0 = vector.load %arg1[%c0, %c0_0] : memref<8x64xbf16, #tpu.memory_space<vmem>>, vector<8x64xbf16>
    %c0_1 = arith.constant 0 : index
    %c0_2 = arith.constant 0 : index
    %1 = vector.load %arg2[%c0_1, %c0_2] : memref<64x128xbf16, #tpu.memory_space<vmem>>, vector<64x128xbf16>
    %cst = arith.constant dense<0.000000e+00> : vector<8x128xf32>
    %2 = tpu.matmul %0, %1, %cst {dimension_numbers = #tpu.dot_dimension_numbers<[1], [0], [0], [1], [0, 0, 1, 1], [], []>} : vector<8x64xbf16>, vector<64x128xbf16>, vector<8x128xf32> -> vector<8x128xf32>
    %c0_3 = arith.constant 0 : index
    %c0_4 = arith.constant 0 : index
    %3 = vector.load %arg3[%c0_3, %c0_4] : memref<1x128xf32, #tpu.memory_space<vmem>>, vector<1x128xf32>
    %4 = vector.broadcast %3 : vector<1x128xf32> to vector<8x128xf32>
    %5 = arith.addf %2, %4 : vector<8x128xf32>
    %c0_5 = arith.constant 0 : index
    %c0_6 = arith.constant 0 : index
    %6 = vector.load %arg4[%c0_5, %c0_6] : memref<1x128xf32, #tpu.memory_space<vmem>>, vector<1x128xf32>
    %c0_7 = arith.constant 0 : index
    %c0_8 = arith.constant 0 : index
    %7 = vector.load %arg5[%c0_7, %c0_8] : memref<1x128xf32, #tpu.memory_space<vmem>>, vector<1x128xf32>
    %cst_9 = arith.constant 0.000000e+00 : f32
    %8 = vector.broadcast %cst_9 : f32 to vector<8x128xf32>
    %9 = arith.cmpf ogt, %5, %8 : vector<8x128xf32>
    %cst_10 = arith.constant 1.000000e-01 : f32
    %10 = vector.broadcast %cst_10 : f32 to vector<8x128xf32>
    %11 = arith.mulf %10, %5 : vector<8x128xf32>
    %12 = arith.select %9, %5, %11 : vector<8x128xi1>, vector<8x128xf32>
    %cst_11 = arith.constant dense<0.000000e+00> : vector<8xf32>
    %13 = vector.multi_reduction <add>, %12, %cst_11 [1] : vector<8x128xf32> to vector<8xf32>
    %14 = vector.shape_cast %13 : vector<8xf32> to vector<8x1xf32>
    %cst_12 = arith.constant 1.280000e+02 : f32
    %15 = vector.broadcast %cst_12 : f32 to vector<8x1xf32>
    %16 = arith.divf %14, %15 : vector<8x1xf32>
    %17 = arith.mulf %12, %12 : vector<8x128xf32>
    %cst_13 = arith.constant dense<0.000000e+00> : vector<8xf32>
    %18 = vector.multi_reduction <add>, %17, %cst_13 [1] : vector<8x128xf32> to vector<8xf32>
    %19 = vector.shape_cast %18 : vector<8xf32> to vector<8x1xf32>
    %cst_14 = arith.constant 1.280000e+02 : f32
    %20 = vector.broadcast %cst_14 : f32 to vector<8x1xf32>
    %21 = arith.divf %19, %20 : vector<8x1xf32>
    %22 = arith.mulf %16, %16 : vector<8x1xf32>
    %23 = arith.subf %21, %22 : vector<8x1xf32>
    %24 = vector.broadcast %16 : vector<8x1xf32> to vector<8x128xf32>
    %25 = arith.subf %12, %24 : vector<8x128xf32>
    %cst_15 = arith.constant 9.99999974E-6 : f32
    %26 = vector.broadcast %cst_15 : f32 to vector<8x1xf32>
    %27 = arith.addf %23, %26 : vector<8x1xf32>
    %28 = math.rsqrt %27 : vector<8x1xf32>
    %29 = vector.broadcast %28 : vector<8x1xf32> to vector<8x128xf32>
    %30 = arith.mulf %25, %29 : vector<8x128xf32>
    %31 = vector.broadcast %6 : vector<1x128xf32> to vector<8x128xf32>
    %32 = arith.mulf %30, %31 : vector<8x128xf32>
    %33 = vector.broadcast %7 : vector<1x128xf32> to vector<8x128xf32>
    %34 = arith.addf %32, %33 : vector<8x128xf32>
    %35 = arith.truncf %34 : vector<8x128xf32> to vector<8x128xbf16>
    %c0_16 = arith.constant 0 : index
    %c0_17 = arith.constant 0 : index
    %36 = vector.load %arg6[%c0_16, %c0_17] : memref<128x128xbf16, #tpu.memory_space<vmem>>, vector<128x128xbf16>
    %cst_18 = arith.constant dense<0.000000e+00> : vector<8x128xf32>
    %37 = tpu.matmul %35, %36, %cst_18 {dimension_numbers = #tpu.dot_dimension_numbers<[1], [0], [0], [1], [0, 0, 1, 1], [], []>} : vector<8x128xbf16>, vector<128x128xbf16>, vector<8x128xf32> -> vector<8x128xf32>
    %c0_19 = arith.constant 0 : index
    %c0_20 = arith.constant 0 : index
    %38 = vector.load %arg7[%c0_19, %c0_20] : memref<1x128xf32, #tpu.memory_space<vmem>>, vector<1x128xf32>
    %39 = vector.broadcast %38 : vector<1x128xf32> to vector<8x128xf32>
    %40 = arith.addf %37, %39 : vector<8x128xf32>
    %c0_21 = arith.constant 0 : index
    %c0_22 = arith.constant 0 : index
    %41 = vector.load %arg8[%c0_21, %c0_22] : memref<1x128xf32, #tpu.memory_space<vmem>>, vector<1x128xf32>
    %c0_23 = arith.constant 0 : index
    %c0_24 = arith.constant 0 : index
    %42 = vector.load %arg9[%c0_23, %c0_24] : memref<1x128xf32, #tpu.memory_space<vmem>>, vector<1x128xf32>
    %cst_25 = arith.constant 0.000000e+00 : f32
    %43 = vector.broadcast %cst_25 : f32 to vector<8x128xf32>
    %44 = arith.cmpf ogt, %40, %43 : vector<8x128xf32>
    %cst_26 = arith.constant 1.000000e-01 : f32
    %45 = vector.broadcast %cst_26 : f32 to vector<8x128xf32>
    %46 = arith.mulf %45, %40 : vector<8x128xf32>
    %47 = arith.select %44, %40, %46 : vector<8x128xi1>, vector<8x128xf32>
    %cst_27 = arith.constant dense<0.000000e+00> : vector<8xf32>
    %48 = vector.multi_reduction <add>, %47, %cst_27 [1] : vector<8x128xf32> to vector<8xf32>
    %49 = vector.shape_cast %48 : vector<8xf32> to vector<8x1xf32>
    %cst_28 = arith.constant 1.280000e+02 : f32
    %50 = vector.broadcast %cst_28 : f32 to vector<8x1xf32>
    %51 = arith.divf %49, %50 : vector<8x1xf32>
    %52 = arith.mulf %47, %47 : vector<8x128xf32>
    %cst_29 = arith.constant dense<0.000000e+00> : vector<8xf32>
    %53 = vector.multi_reduction <add>, %52, %cst_29 [1] : vector<8x128xf32> to vector<8xf32>
    %54 = vector.shape_cast %53 : vector<8xf32> to vector<8x1xf32>
    %cst_30 = arith.constant 1.280000e+02 : f32
    %55 = vector.broadcast %cst_30 : f32 to vector<8x1xf32>
    %56 = arith.divf %54, %55 : vector<8x1xf32>
    %57 = arith.mulf %51, %51 : vector<8x1xf32>
    %58 = arith.subf %56, %57 : vector<8x1xf32>
    %59 = vector.broadcast %51 : vector<8x1xf32> to vector<8x128xf32>
    %60 = arith.subf %47, %59 : vector<8x128xf32>
    %cst_31 = arith.constant 9.99999974E-6 : f32
    %61 = vector.broadcast %cst_31 : f32 to vector<8x1xf32>
    %62 = arith.addf %58, %61 : vector<8x1xf32>
    %63 = math.rsqrt %62 : vector<8x1xf32>
    %64 = vector.broadcast %63 : vector<8x1xf32> to vector<8x128xf32>
    %65 = arith.mulf %60, %64 : vector<8x128xf32>
    %66 = vector.broadcast %41 : vector<1x128xf32> to vector<8x128xf32>
    %67 = arith.mulf %65, %66 : vector<8x128xf32>
    %68 = vector.broadcast %42 : vector<1x128xf32> to vector<8x128xf32>
    %69 = arith.addf %67, %68 : vector<8x128xf32>
    %70 = arith.truncf %69 : vector<8x128xf32> to vector<8x128xbf16>
    %c0_32 = arith.constant 0 : index
    %c0_33 = arith.constant 0 : index
    %71 = vector.load %arg10[%c0_32, %c0_33] : memref<128x128xbf16, #tpu.memory_space<vmem>>, vector<128x128xbf16>
    %cst_34 = arith.constant dense<0.000000e+00> : vector<8x128xf32>
    %72 = tpu.matmul %70, %71, %cst_34 {dimension_numbers = #tpu.dot_dimension_numbers<[1], [0], [0], [1], [0, 0, 1, 1], [], []>} : vector<8x128xbf16>, vector<128x128xbf16>, vector<8x128xf32> -> vector<8x128xf32>
    %c0_35 = arith.constant 0 : index
    %c0_36 = arith.constant 0 : index
    %73 = vector.load %arg11[%c0_35, %c0_36] : memref<1x128xf32, #tpu.memory_space<vmem>>, vector<1x128xf32>
    %74 = vector.broadcast %73 : vector<1x128xf32> to vector<8x128xf32>
    %75 = arith.addf %72, %74 : vector<8x128xf32>
    %c0_37 = arith.constant 0 : index
    %c0_38 = arith.constant 0 : index
    %76 = vector.load %arg12[%c0_37, %c0_38] : memref<1x128xf32, #tpu.memory_space<vmem>>, vector<1x128xf32>
    %c0_39 = arith.constant 0 : index
    %c0_40 = arith.constant 0 : index
    %77 = vector.load %arg13[%c0_39, %c0_40] : memref<1x128xf32, #tpu.memory_space<vmem>>, vector<1x128xf32>
    %cst_41 = arith.constant 0.000000e+00 : f32
    %78 = vector.broadcast %cst_41 : f32 to vector<8x128xf32>
    %79 = arith.cmpf ogt, %75, %78 : vector<8x128xf32>
    %cst_42 = arith.constant 1.000000e-01 : f32
    %80 = vector.broadcast %cst_42 : f32 to vector<8x128xf32>
    %81 = arith.mulf %80, %75 : vector<8x128xf32>
    %82 = arith.select %79, %75, %81 : vector<8x128xi1>, vector<8x128xf32>
    %cst_43 = arith.constant dense<0.000000e+00> : vector<8xf32>
    %83 = vector.multi_reduction <add>, %82, %cst_43 [1] : vector<8x128xf32> to vector<8xf32>
    %84 = vector.shape_cast %83 : vector<8xf32> to vector<8x1xf32>
    %cst_44 = arith.constant 1.280000e+02 : f32
    %85 = vector.broadcast %cst_44 : f32 to vector<8x1xf32>
    %86 = arith.divf %84, %85 : vector<8x1xf32>
    %87 = arith.mulf %82, %82 : vector<8x128xf32>
    %cst_45 = arith.constant dense<0.000000e+00> : vector<8xf32>
    %88 = vector.multi_reduction <add>, %87, %cst_45 [1] : vector<8x128xf32> to vector<8xf32>
    %89 = vector.shape_cast %88 : vector<8xf32> to vector<8x1xf32>
    %cst_46 = arith.constant 1.280000e+02 : f32
    %90 = vector.broadcast %cst_46 : f32 to vector<8x1xf32>
    %91 = arith.divf %89, %90 : vector<8x1xf32>
    %92 = arith.mulf %86, %86 : vector<8x1xf32>
    %93 = arith.subf %91, %92 : vector<8x1xf32>
    %94 = vector.broadcast %86 : vector<8x1xf32> to vector<8x128xf32>
    %95 = arith.subf %82, %94 : vector<8x128xf32>
    %cst_47 = arith.constant 9.99999974E-6 : f32
    %96 = vector.broadcast %cst_47 : f32 to vector<8x1xf32>
    %97 = arith.addf %93, %96 : vector<8x1xf32>
    %98 = math.rsqrt %97 : vector<8x1xf32>
    %99 = vector.broadcast %98 : vector<8x1xf32> to vector<8x128xf32>
    %100 = arith.mulf %95, %99 : vector<8x128xf32>
    %101 = vector.broadcast %76 : vector<1x128xf32> to vector<8x128xf32>
    %102 = arith.mulf %100, %101 : vector<8x128xf32>
    %103 = vector.broadcast %77 : vector<1x128xf32> to vector<8x128xf32>
    %104 = arith.addf %102, %103 : vector<8x128xf32>
    %105 = arith.truncf %104 : vector<8x128xf32> to vector<8x128xbf16>
    %c0_48 = arith.constant 0 : index
    %c0_49 = arith.constant 0 : index
    %106 = vector.load %arg14[%c0_48, %c0_49] : memref<128x128xbf16, #tpu.memory_space<vmem>>, vector<128x128xbf16>
    %cst_50 = arith.constant dense<0.000000e+00> : vector<8x128xf32>
    %107 = tpu.matmul %105, %106, %cst_50 {dimension_numbers = #tpu.dot_dimension_numbers<[1], [0], [0], [1], [0, 0, 1, 1], [], []>} : vector<8x128xbf16>, vector<128x128xbf16>, vector<8x128xf32> -> vector<8x128xf32>
    %c0_51 = arith.constant 0 : index
    %c0_52 = arith.constant 0 : index
    %108 = vector.load %arg15[%c0_51, %c0_52] : memref<1x128xf32, #tpu.memory_space<vmem>>, vector<1x128xf32>
    %109 = vector.broadcast %108 : vector<1x128xf32> to vector<8x128xf32>
    %110 = arith.addf %107, %109 : vector<8x128xf32>
    %c0_53 = arith.constant 0 : index
    %c0_54 = arith.constant 0 : index
    %111 = vector.load %arg16[%c0_53, %c0_54] : memref<1x128xf32, #tpu.memory_space<vmem>>, vector<1x128xf32>
    %c0_55 = arith.constant 0 : index
    %c0_56 = arith.constant 0 : index
    %112 = vector.load %arg17[%c0_55, %c0_56] : memref<1x128xf32, #tpu.memory_space<vmem>>, vector<1x128xf32>
    %cst_57 = arith.constant 0.000000e+00 : f32
    %113 = vector.broadcast %cst_57 : f32 to vector<8x128xf32>
    %114 = arith.cmpf ogt, %110, %113 : vector<8x128xf32>
    %cst_58 = arith.constant 1.000000e-01 : f32
    %115 = vector.broadcast %cst_58 : f32 to vector<8x128xf32>
    %116 = arith.mulf %115, %110 : vector<8x128xf32>
    %117 = arith.select %114, %110, %116 : vector<8x128xi1>, vector<8x128xf32>
    %cst_59 = arith.constant dense<0.000000e+00> : vector<8xf32>
    %118 = vector.multi_reduction <add>, %117, %cst_59 [1] : vector<8x128xf32> to vector<8xf32>
    %119 = vector.shape_cast %118 : vector<8xf32> to vector<8x1xf32>
    %cst_60 = arith.constant 1.280000e+02 : f32
    %120 = vector.broadcast %cst_60 : f32 to vector<8x1xf32>
    %121 = arith.divf %119, %120 : vector<8x1xf32>
    %122 = arith.mulf %117, %117 : vector<8x128xf32>
    %cst_61 = arith.constant dense<0.000000e+00> : vector<8xf32>
    %123 = vector.multi_reduction <add>, %122, %cst_61 [1] : vector<8x128xf32> to vector<8xf32>
    %124 = vector.shape_cast %123 : vector<8xf32> to vector<8x1xf32>
    %cst_62 = arith.constant 1.280000e+02 : f32
    %125 = vector.broadcast %cst_62 : f32 to vector<8x1xf32>
    %126 = arith.divf %124, %125 : vector<8x1xf32>
    %127 = arith.mulf %121, %121 : vector<8x1xf32>
    %128 = arith.subf %126, %127 : vector<8x1xf32>
    %129 = vector.broadcast %121 : vector<8x1xf32> to vector<8x128xf32>
    %130 = arith.subf %117, %129 : vector<8x128xf32>
    %cst_63 = arith.constant 9.99999974E-6 : f32
    %131 = vector.broadcast %cst_63 : f32 to vector<8x1xf32>
    %132 = arith.addf %128, %131 : vector<8x1xf32>
    %133 = math.rsqrt %132 : vector<8x1xf32>
    %134 = vector.broadcast %133 : vector<8x1xf32> to vector<8x128xf32>
    %135 = arith.mulf %130, %134 : vector<8x128xf32>
    %136 = vector.broadcast %111 : vector<1x128xf32> to vector<8x128xf32>
    %137 = arith.mulf %135, %136 : vector<8x128xf32>
    %138 = vector.broadcast %112 : vector<1x128xf32> to vector<8x128xf32>
    %139 = arith.addf %137, %138 : vector<8x128xf32>
    %140 = arith.truncf %139 : vector<8x128xf32> to vector<8x128xbf16>
    %c0_64 = arith.constant 0 : index
    %c0_65 = arith.constant 0 : index
    %141 = vector.load %arg18[%c0_64, %c0_65] : memref<128x128xbf16, #tpu.memory_space<vmem>>, vector<128x128xbf16>
    %cst_66 = arith.constant dense<0.000000e+00> : vector<8x128xf32>
    %142 = tpu.matmul %140, %141, %cst_66 {dimension_numbers = #tpu.dot_dimension_numbers<[1], [0], [0], [1], [0, 0, 1, 1], [], []>} : vector<8x128xbf16>, vector<128x128xbf16>, vector<8x128xf32> -> vector<8x128xf32>
    %c0_67 = arith.constant 0 : index
    %c0_68 = arith.constant 0 : index
    %143 = vector.load %arg19[%c0_67, %c0_68] : memref<1x128xf32, #tpu.memory_space<vmem>>, vector<1x128xf32>
    %144 = vector.broadcast %143 : vector<1x128xf32> to vector<8x128xf32>
    %145 = arith.addf %142, %144 : vector<8x128xf32>
    %c0_69 = arith.constant 0 : index
    %c0_70 = arith.constant 0 : index
    %146 = vector.load %arg20[%c0_69, %c0_70] : memref<8x128xf32, #tpu.memory_space<vmem>>, vector<8x128xf32>
    tpu.vector_store %arg20[%c0_69, %c0_70], %145 {strides = array<i32>} : memref<8x128xf32, #tpu.memory_space<vmem>>, vector<8x128xf32>,
    return
  }
  func.func @transform_0(%arg0: i32) -> (i32, i32) {
    %c0_i32 = arith.constant 0 : i32
    %c0_i32_0 = arith.constant 0 : i32
    return %arg0, %c0_i32 : i32, i32
  }
  func.func @transform_1(%arg0: i32) -> (i32, i32) {
    %c0_i32 = arith.constant 0 : i32
    %c0_i32_0 = arith.constant 0 : i32
    %c0_i32_1 = arith.constant 0 : i32
    return %c0_i32, %c0_i32_0 : i32, i32
  }
  func.func @transform_2(%arg0: i32) -> (i32, i32) {
    %c0_i32 = arith.constant 0 : i32
    %c0_i32_0 = arith.constant 0 : i32
    %c0_i32_1 = arith.constant 0 : i32
    return %c0_i32, %c0_i32_0 : i32, i32
  }
  func.func @transform_3(%arg0: i32) -> (i32, i32) {
    %c0_i32 = arith.constant 0 : i32
    %c0_i32_0 = arith.constant 0 : i32
    %c0_i32_1 = arith.constant 0 : i32
    return %c0_i32, %c0_i32_0 : i32, i32
  }
  func.func @transform_4(%arg0: i32) -> (i32, i32) {
    %c0_i32 = arith.constant 0 : i32
    %c0_i32_0 = arith.constant 0 : i32
    %c0_i32_1 = arith.constant 0 : i32
    return %c0_i32, %c0_i32_0 : i32, i32
  }
  func.func @transform_5(%arg0: i32) -> (i32, i32) {
    %c0_i32 = arith.constant 0 : i32
    %c0_i32_0 = arith.constant 0 : i32
    %c0_i32_1 = arith.constant 0 : i32
    return %c0_i32, %c0_i32_0 : i32, i32
  }
  func.func @transform_6(%arg0: i32) -> (i32, i32) {
    %c0_i32 = arith.constant 0 : i32
    %c0_i32_0 = arith.constant 0 : i32
    %c0_i32_1 = arith.constant 0 : i32
    return %c0_i32, %c0_i32_0 : i32, i32
  }
  func.func @transform_7(%arg0: i32) -> (i32, i32) {
    %c0_i32 = arith.constant 0 : i32
    %c0_i32_0 = arith.constant 0 : i32
    %c0_i32_1 = arith.constant 0 : i32
    return %c0_i32, %c0_i32_0 : i32, i32
  }
  func.func @transform_8(%arg0: i32) -> (i32, i32) {
    %c0_i32 = arith.constant 0 : i32
    %c0_i32_0 = arith.constant 0 : i32
    %c0_i32_1 = arith.constant 0 : i32
    return %c0_i32, %c0_i32_0 : i32, i32
  }
  func.func @transform_9(%arg0: i32) -> (i32, i32) {
    %c0_i32 = arith.constant 0 : i32
    %c0_i32_0 = arith.constant 0 : i32
    %c0_i32_1 = arith.constant 0 : i32
    return %c0_i32, %c0_i32_0 : i32, i32
  }
  func.func @transform_10(%arg0: i32) -> (i32, i32) {
    %c0_i32 = arith.constant 0 : i32
    %c0_i32_0 = arith.constant 0 : i32
    %c0_i32_1 = arith.constant 0 : i32
    return %c0_i32, %c0_i32_0 : i32, i32
  }
  func.func @transform_11(%arg0: i32) -> (i32, i32) {
    %c0_i32 = arith.constant 0 : i32
    %c0_i32_0 = arith.constant 0 : i32
    %c0_i32_1 = arith.constant 0 : i32
    return %c0_i32, %c0_i32_0 : i32, i32
  }
  func.func @transform_12(%arg0: i32) -> (i32, i32) {
    %c0_i32 = arith.constant 0 : i32
    %c0_i32_0 = arith.constant 0 : i32
    %c0_i32_1 = arith.constant 0 : i32
    return %c0_i32, %c0_i32_0 : i32, i32
  }
  func.func @transform_13(%arg0: i32) -> (i32, i32) {
    %c0_i32 = arith.constant 0 : i32
    %c0_i32_0 = arith.constant 0 : i32
    %c0_i32_1 = arith.constant 0 : i32
    return %c0_i32, %c0_i32_0 : i32, i32
  }
  func.func @transform_14(%arg0: i32) -> (i32, i32) {
    %c0_i32 = arith.constant 0 : i32
    %c0_i32_0 = arith.constant 0 : i32
    %c0_i32_1 = arith.constant 0 : i32
    return %c0_i32, %c0_i32_0 : i32, i32
  }
  func.func @transform_15(%arg0: i32) -> (i32, i32) {
    %c0_i32 = arith.constant 0 : i32
    %c0_i32_0 = arith.constant 0 : i32
    %c0_i32_1 = arith.constant 0 : i32
    return %c0_i32, %c0_i32_0 : i32, i32
  }
  func.func @transform_16(%arg0: i32) -> (i32, i32) {
    %c0_i32 = arith.constant 0 : i32
    %c0_i32_0 = arith.constant 0 : i32
    %c0_i32_1 = arith.constant 0 : i32
    return %c0_i32, %c0_i32_0 : i32, i32
  }
  func.func @transform_17(%arg0: i32) -> (i32, i32) {
    %c0_i32 = arith.constant 0 : i32
    %c0_i32_0 = arith.constant 0 : i32
    %c0_i32_1 = arith.constant 0 : i32
    return %c0_i32, %c0_i32_0 : i32, i32
  }
  func.func @transform_18(%arg0: i32) -> (i32, i32) {
    %c0_i32 = arith.constant 0 : i32
    %c0_i32_0 = arith.constant 0 : i32
    %c0_i32_1 = arith.constant 0 : i32
    return %c0_i32, %c0_i32_0 : i32, i32
  }
  func.func @transform_19(%arg0: i32) -> (i32, i32) {
    %c0_i32 = arith.constant 0 : i32
    %c0_i32_0 = arith.constant 0 : i32
    return %arg0, %c0_i32 : i32, i32
  }
}

</mosaic_0001>

<bundles_post_ra>
// kernel: advantage_net_forward.1
= control target key start
LH: loop header
LB: loop body
LE: loop exit
PB: predicated region body
PF: predicated region fallthrough
CT: control target
= control target key end

     0   :  { %s1918_s0 = inlined_call_operand.vmem [shape: bf16[8,64], index: 0, kind: input, shape index: {}]   ;;  %s1919_s1 = inlined_call_operand.hbm [shape: bf16[64,128], index: 1, kind: input, shape index: {}]   ;;  %s1920_s2 = inlined_call_operand.vmem [shape: f32[1,128], index: 2, kind: input, shape index: {}]   ;;  %s1921_s3 = inlined_call_operand.vmem [shape: f32[1,128], index: 3, kind: input, shape index: {}]   ;;  %s1922_s4 = inlined_call_operand.hbm [shape: f32[1,128], index: 4, kind: input, shape index: {}]   ;;  %s1923_s5 = inlined_call_operand.vmem [shape: bf16[128,128], index: 5, kind: input, shape index: {}]   ;;  %s1924_s6 = inlined_call_operand.hbm [shape: f32[1,128], index: 6, kind: input, shape index: {}]   ;;  %s1925_s7 = inlined_call_operand.hbm [shape: f32[1,128], index: 7, kind: input, shape index: {}]   ;;  %s1926_s8 = inlined_call_operand.hbm [shape: f32[1,128], index: 8, kind: input, shape index: {}]   ;;  %s1927_s9 = inlined_call_operand.hbm [shape: bf16[128,128], index: 9, kind: input, shape index: {}]   ;;  %s1928_s10 = inlined_call_operand.hbm [shape: f32[1,128], index: 10, kind: input, shape index: {}]   ;;  %s1929_s11 = inlined_call_operand.hbm [shape: f32[1,128], index: 11, kind: input, shape index: {}]   ;;  %s1930_s12 = inlined_call_operand.hbm [shape: f32[1,128], index: 12, kind: input, shape index: {}]   ;;  %s1931_s13 = inlined_call_operand.hbm [shape: bf16[128,128], index: 13, kind: input, shape index: {}]   ;;  %s1932_s14 = inlined_call_operand.hbm [shape: f32[1,128], index: 14, kind: input, shape index: {}]   ;;  %s1933_s15 = inlined_call_operand.hbm [shape: f32[1,128], index: 15, kind: input, shape index: {}]   ;;  %s1934_s16 = inlined_call_operand.hbm [shape: f32[1,128], index: 16, kind: input, shape index: {}]   ;;  %s1935_s17 = inlined_call_operand.hbm [shape: bf16[128,128], index: 17, kind: input, shape index: {}]   ;;  %s1936_s18 = inlined_call_operand.hbm [shape: f32[1,128], index: 18, kind: input, shape index: {}]   ;;  %s1937_s19 = inlined_call_operand.vmem [shape: f32[8,128], index: 19, kind: output, shape index: {}]  }
   0x1   :  { %1939 = sst [smem:[#allocation33_spill]] %s1918_s0 }
   0x2   :  { %1940 = sst [smem:[#allocation34_spill]] %s1919_s1 }
   0x3   :  { %1941 = sst [smem:[#allocation35_spill]] %s1920_s2 }
   0x4   :  { %1942 = sst [smem:[#allocation36_spill]] %s1921_s3 }
   0x5   :  { %24 = vsyncpa [#allocation3], 0 }
   0x6   :  { %25 = vsyncpa [#allocation5], 0 }
   0x7   :  { %26 = vsyncpa [#allocation8], 0 }
   0x8   :  { %27 = vsyncpa [#allocation11], 0 }
   0x9   :  { %28 = vsyncpa [#allocation14], 0 }
   0xa   :  { %29 = vsyncpa [#allocation17], 0 }
   0xb   :  { %30 = vsyncpa [#allocation20], 0 }
   0xc   :  { %31 = vsyncpa [#allocation23], 0  ;;  %s1510_s0 = smov [#allocation4]   ;;  %s1511_s20 = smov [#allocation7]  }
   0xd   :  { %s56_s30 = sshll.u32 %s1510_s0, 4  ;;  %s78_s21 = sshll.u32 %s1511_s20, 4  ;;  %s57_s30 = int_to_ptr.vmem [resolvable:$true] %s56_s30  ;;  %s79_s21 = int_to_ptr.vmem [resolvable:$true] %s78_s21 }
   0xe   :  { %s1164_s2 = scalar_lea.hbm %s1922_s4, 16 }
   0xf   :  { %p1165_p0 = scmp.ne.s32.totalorder %s1922_s4, %s1164_s2  ;;  %p1168_p1 = scmp.lt.u32.totalorder %s1164_s2, %s1922_s4 }
  0x11   :  { %p1170_p2 = pnand %p1168_p1, %p1165_p0 }
  0x13   :  { %1173 = shalt.err (!%p1170_p2)
}
  0x14   :  { %s1174_s26 = scalar_lea.vmem %s57_s30, 16  ;;  %s1178_s27 = scalar_lea.vmem %s57_s30, 32 }
  0x15   :  { %p1175_p3 = scmp.ne.s32.totalorder %s57_s30, %s1174_s26  ;;  %p1179_p4 = scmp.lt.s32.totalorder %s57_s30, %s57_s30 }
  0x16   :  { %p1180_p5 = scmp.lt.s32.totalorder %s1178_s27, %s1174_s26 }
  0x18   :  { %p1181_p6 = por %p1180_p5, %p1179_p4 }
  0x1a   :  { %p1182_p7 = pnand %p1181_p6, %p1175_p3 }
  0x1c   :  { %1185 = shalt.err (!%p1182_p7)
}
  0x1d   :  { %59 = dma.hbm_to_vmem [thread:$0]  %s1922_s4, 16, %s57_s30, [#allocation5]  }
  0x1e   :  { %s1186_s1 = scalar_lea.hbm %s1925_s7, 16 }
  0x1f   :  { %p1187_p8 = scmp.ne.s32.totalorder %s1925_s7, %s1186_s1  ;;  %p1190_p9 = scmp.lt.u32.totalorder %s1186_s1, %s1925_s7 }
  0x21   :  { %p1192_p10 = pnand %p1190_p9, %p1187_p8 }
  0x23   :  { %1195 = shalt.err (!%p1192_p10)
}
  0x24   :  { %s1196_s25 = scalar_lea.vmem %s79_s21, 16  ;;  %s1200_s3 = scalar_lea.vmem %s79_s21, 32 }
  0x25   :  { %p1197_p11 = scmp.ne.s32.totalorder %s79_s21, %s1196_s25  ;;  %p1201_p12 = scmp.lt.s32.totalorder %s79_s21, %s79_s21 }
  0x26   :  { %p1202_p13 = scmp.lt.s32.totalorder %s1200_s3, %s1196_s25 }
  0x28   :  { %p1203_p0 = por %p1202_p13, %p1201_p12 }
  0x2a   :  { %p1204_p1 = pnand %p1203_p0, %p1197_p11 }
  0x2c   :  { %1207 = shalt.err (!%p1204_p1)
}
  0x2d   :  { %81 = dma.hbm_to_vmem [thread:$0]  %s1925_s7, 16, %s79_s21, [#allocation8]  }
  0x2e   :  { %s1512_s26 = smov [#allocation10]   ;;  %s1513_s28 = smov [#allocation13]  }
  0x2f   :  { %s97_s27 = sshll.u32 %s1512_s26, 4  ;;  %s120_s29 = sshll.u32 %s1513_s28, 4  ;;  %s98_s27 = int_to_ptr.vmem [resolvable:$true] %s97_s27  ;;  %s1653_s29 = int_to_ptr.vmem [resolvable:$true] %s120_s29 }
  0x30   :  { %s1208_s1 = scalar_lea.hbm %s1927_s9, 1024 }
  0x31   :  { %p1209_p2 = scmp.ne.s32.totalorder %s1927_s9, %s1208_s1  ;;  %p1212_p3 = scmp.lt.u32.totalorder %s1208_s1, %s1927_s9 }
  0x33   :  { %p1214_p4 = pnand %p1212_p3, %p1209_p2 }
  0x35   :  { %1217 = shalt.err (!%p1214_p4)
}
  0x36   :  { %s1218_s7 = scalar_lea.vmem %s98_s27, 1024  ;;  %p1223_p6 = scmp.lt.s32.totalorder %s98_s27, %s98_s27 }
  0x37   :  { %p1219_p5 = scmp.ne.s32.totalorder %s98_s27, %s1218_s7  ;;  %p1224_p7 = scmp.lt.s32.totalorder %s1218_s7, %s1218_s7 }
  0x39   :  { %p1225_p8 = por %p1224_p7, %p1223_p6 }
  0x3b   :  { %p1226_p9 = pnand %p1225_p8, %p1219_p5 }
  0x3d   :  { %1229 = shalt.err (!%p1226_p9)
}
  0x3e   :  { %s1514_s21 = smov 64   ;;  %s1515_s25 = smov 4  }
  0x3f   :  { %103 = dma.hbm_to_vmem [thread:$0]  %s1927_s9, 1024, %s98_s27, [#allocation11], %s1514_s21, %s1514_s21, %s1515_s25  }
  0x40   :  { %s1230_s28 = scalar_lea.hbm %s1929_s11, 16 }
  0x41   :  { %p1231_p10 = scmp.ne.s32.totalorder %s1929_s11, %s1230_s28  ;;  %p1234_p11 = scmp.lt.u32.totalorder %s1230_s28, %s1929_s11 }
  0x43   :  { %p1236_p12 = pnand %p1234_p11, %p1231_p10 }
  0x45   :  { %1239 = shalt.err (!%p1236_p12)
}
  0x46   :  { %s1240_s2 = scalar_lea.vmem %s1653_s29, 16  ;;  %s1244_s9 = scalar_lea.vmem %s1653_s29, 32 }
  0x47   :  { %p1241_p13 = scmp.ne.s32.totalorder %s1653_s29, %s1240_s2  ;;  %p1245_p0 = scmp.lt.s32.totalorder %s1653_s29, %s1653_s29 }
  0x48   :  { %p1246_p1 = scmp.lt.s32.totalorder %s1244_s9, %s1240_s2 }
  0x4a   :  { %p1247_p2 = por %p1246_p1, %p1245_p0 }
  0x4c   :  { %p1248_p3 = pnand %p1247_p2, %p1241_p13 }
  0x4e   :  { %1251 = shalt.err (!%p1248_p3)
}
  0x4f   :  { %123 = dma.hbm_to_vmem [thread:$0]  %s1929_s11, 16, %s1653_s29, [#allocation14]  }
  0x50   :  { %s1516_s24 = smov [#allocation16]   ;;  %s1517_s3 = smov [#allocation19]  }
  0x51   :  { %s139_s7 = sshll.u32 %s1516_s24, 4  ;;  %s162_s4 = sshll.u32 %s1517_s3, 4  ;;  %s140_s7 = int_to_ptr.vmem [resolvable:$true] %s139_s7  ;;  %s163_s4 = int_to_ptr.vmem [resolvable:$true] %s162_s4 }
  0x52   :  { %s1252_s28 = scalar_lea.hbm %s1931_s13, 1024 }
  0x53   :  { %p1253_p4 = scmp.ne.s32.totalorder %s1931_s13, %s1252_s28  ;;  %p1256_p5 = scmp.lt.u32.totalorder %s1252_s28, %s1931_s13 }
  0x55   :  { %p1258_p6 = pnand %p1256_p5, %p1253_p4 }
  0x57   :  { %1261 = shalt.err (!%p1258_p6)
}
  0x58   :  { %s1262_s11 = scalar_lea.vmem %s140_s7, 1024  ;;  %p1267_p8 = scmp.lt.s32.totalorder %s140_s7, %s140_s7 }
  0x59   :  { %p1263_p7 = scmp.ne.s32.totalorder %s140_s7, %s1262_s11  ;;  %p1268_p9 = scmp.lt.s32.totalorder %s1262_s11, %s1262_s11 }
  0x5b   :  { %p1269_p10 = por %p1268_p9, %p1267_p8 }
  0x5d   :  { %p1270_p11 = pnand %p1269_p10, %p1263_p7 }
  0x5f   :  { %1273 = shalt.err (!%p1270_p11)
}
  0x60   :  { %145 = dma.hbm_to_vmem [thread:$0]  %s1931_s13, 1024, %s140_s7, [#allocation17], %s1514_s21, %s1514_s21, %s1515_s25  }
  0x61   :  { %s1274_s23 = scalar_lea.hbm %s1933_s15, 16 }
  0x62   :  { %p1275_p12 = scmp.ne.s32.totalorder %s1933_s15, %s1274_s23  ;;  %p1278_p13 = scmp.lt.u32.totalorder %s1274_s23, %s1933_s15 }
  0x64   :  { %p1280_p0 = pnand %p1278_p13, %p1275_p12 }
  0x66   :  { %1283 = shalt.err (!%p1280_p0)
}
  0x67   :  { %s1284_s28 = scalar_lea.vmem %s163_s4, 16  ;;  %s1288_s0 = scalar_lea.vmem %s163_s4, 32 }
  0x68   :  { %p1285_p1 = scmp.ne.s32.totalorder %s163_s4, %s1284_s28  ;;  %p1289_p2 = scmp.lt.s32.totalorder %s163_s4, %s163_s4 }
  0x69   :  { %p1290_p3 = scmp.lt.s32.totalorder %s1288_s0, %s1284_s28 }
  0x6b   :  { %p1291_p4 = por %p1290_p3, %p1289_p2 }
  0x6d   :  { %p1292_p5 = pnand %p1291_p4, %p1285_p1 }
  0x6f   :  { %1295 = shalt.err (!%p1292_p5)
}
  0x70   :  { %165 = dma.hbm_to_vmem [thread:$0]  %s1933_s15, 16, %s163_s4, [#allocation20]  }
  0x71   :  { %s1518_s20 = smov [#allocation22]   ;;  %s1519_s22 = smov [#allocation2]  }
  0x72   :  { %s181_s1 = sshll.u32 %s1518_s20, 4  ;;  %s39_s11 = sshll.u32 %s1519_s22, 4  ;;  %s182_s1 = int_to_ptr.vmem [resolvable:$true] %s181_s1  ;;  %s1715_s11 = int_to_ptr.vmem [resolvable:$true] %s39_s11 }
  0x73   :  { %s1296_s9 = scalar_lea.hbm %s1935_s17, 1024 }
  0x74   :  { %p1297_p6 = scmp.ne.s32.totalorder %s1935_s17, %s1296_s9  ;;  %p1300_p7 = scmp.lt.u32.totalorder %s1296_s9, %s1935_s17 }
  0x76   :  { %p1302_p8 = pnand %p1300_p7, %p1297_p6 }
  0x78   :  { %1305 = shalt.err (!%p1302_p8)
}
  0x79   :  { %s1306_s15 = scalar_lea.vmem %s182_s1, 1024  ;;  %p1311_p10 = scmp.lt.s32.totalorder %s182_s1, %s182_s1 }
  0x7a   :  { %p1307_p9 = scmp.ne.s32.totalorder %s182_s1, %s1306_s15  ;;  %p1312_p11 = scmp.lt.s32.totalorder %s1306_s15, %s1306_s15 }
  0x7c   :  { %p1313_p12 = por %p1312_p11, %p1311_p10 }
  0x7e   :  { %p1314_p13 = pnand %p1313_p12, %p1307_p9 }
  0x80   :  { %1317 = shalt.err (!%p1314_p13)
}
  0x81   :  { %187 = dma.hbm_to_vmem [thread:$0]  %s1935_s17, 1024, %s182_s1, [#allocation23], %s1514_s21, %s1514_s21, %s1515_s25  }
  0x82   :  { %s1943_s0 = sld [smem:[#allocation34_spill]] }
  0x88   :  { %s1318_s13 = scalar_lea.hbm %s1943_s0, 512 }
  0x89   :  { %p1319_p0 = scmp.ne.s32.totalorder %s1943_s0, %s1318_s13  ;;  %p1322_p1 = scmp.lt.u32.totalorder %s1318_s13, %s1943_s0 }
  0x8b   :  { %p1324_p2 = pnand %p1322_p1, %p1319_p0 }
  0x8d   :  { %1327 = shalt.err (!%p1324_p2)
}
  0x8e   :  { %s1328_s2 = scalar_lea.vmem %s1715_s11, 512  ;;  %p1333_p4 = scmp.lt.s32.totalorder %s1715_s11, %s1715_s11 }
  0x8f   :  { %p1329_p3 = scmp.ne.s32.totalorder %s1715_s11, %s1328_s2  ;;  %p1334_p5 = scmp.lt.s32.totalorder %s1328_s2, %s1328_s2 }
  0x91   :  { %p1335_p6 = por %p1334_p5, %p1333_p4 }
  0x93   :  { %p1336_p7 = pnand %p1335_p6, %p1329_p3 }
  0x95   :  { %1339 = shalt.err (!%p1336_p7)
}
  0x96   :  { %45 = dma.hbm_to_vmem [thread:$0]  %s1943_s0, 512, %s1715_s11, [#allocation3], %s1514_s21, %s1514_s21, %s1515_s25  }
  0x97   :  { %s1520_s9 = smov [#allocation6]   ;;  %s1521_s23 = smov [#allocation9]  }
  0x98   :  { %s68_s27 = sshll.u32 %s1520_s9, 4  ;;  %s88_s24 = sshll.u32 %s1521_s23, 4  ;;  %s69_s27 = int_to_ptr.vmem [resolvable:$true] %s68_s27  ;;  %s89_s24 = int_to_ptr.vmem [resolvable:$true] %s88_s24 }
  0x99   :  { %s1340_s4 = scalar_lea.hbm %s1924_s6, 16 }
  0x9a   :  { %p1341_p8 = scmp.ne.s32.totalorder %s1924_s6, %s1340_s4  ;;  %p1344_p9 = scmp.lt.u32.totalorder %s1340_s4, %s1924_s6 }
  0x9c   :  { %p1346_p10 = pnand %p1344_p9, %p1341_p8 }
  0x9e   :  { %1349 = shalt.err (!%p1346_p10)
}
  0x9f   :  { %s1350_s21 = scalar_lea.vmem %s69_s27, 16  ;;  %s1354_s25 = scalar_lea.vmem %s69_s27, 32 }
  0xa0   :  { %p1351_p11 = scmp.ne.s32.totalorder %s69_s27, %s1350_s21  ;;  %p1355_p12 = scmp.lt.s32.totalorder %s69_s27, %s69_s27 }
  0xa1   :  { %p1356_p13 = scmp.lt.s32.totalorder %s1354_s25, %s1350_s21 }
  0xa3   :  { %p1357_p0 = por %p1356_p13, %p1355_p12 }
  0xa5   :  { %p1358_p1 = pnand %p1357_p0, %p1351_p11 }
  0xa7   :  { %1361 = shalt.err (!%p1358_p1)
}
  0xa8   :  { %71 = dma.hbm_to_vmem [thread:$0]  %s1924_s6, 16, %s69_s27, [#allocation5]  }
  0xa9   :  { %s1362_s22 = scalar_lea.hbm %s1926_s8, 16 }
  0xaa   :  { %p1363_p2 = scmp.ne.s32.totalorder %s1926_s8, %s1362_s22  ;;  %p1366_p3 = scmp.lt.u32.totalorder %s1362_s22, %s1926_s8 }
  0xac   :  { %p1368_p4 = pnand %p1366_p3, %p1363_p2 }
  0xae   :  { %1371 = shalt.err (!%p1368_p4)
}
  0xaf   :  { %s1372_s9 = scalar_lea.vmem %s89_s24, 16  ;;  %s1376_s23 = scalar_lea.vmem %s89_s24, 32 }
  0xb0   :  { %p1373_p5 = scmp.ne.s32.totalorder %s89_s24, %s1372_s9  ;;  %p1377_p6 = scmp.lt.s32.totalorder %s89_s24, %s89_s24 }
  0xb1   :  { %p1378_p7 = scmp.lt.s32.totalorder %s1376_s23, %s1372_s9 }
  0xb3   :  { %p1379_p8 = por %p1378_p7, %p1377_p6 }
  0xb5   :  { %p1380_p9 = pnand %p1379_p8, %p1373_p5 }
  0xb7   :  { %1383 = shalt.err (!%p1380_p9)
}
  0xb8   :  { %91 = dma.hbm_to_vmem [thread:$0]  %s1926_s8, 16, %s89_s24, [#allocation8]  }
  0xb9   :  { %s1522_s3 = smov [#allocation12]   ;;  %s1523_s4 = smov [#allocation15]  }
  0xba   :  { %s110_s15 = sshll.u32 %s1522_s3, 4  ;;  %s130_s30 = sshll.u32 %s1523_s4, 4  ;;  %s111_s15 = int_to_ptr.vmem [resolvable:$true] %s110_s15  ;;  %s131_s30 = int_to_ptr.vmem [resolvable:$true] %s130_s30 }
  0xbb   :  { %s1384_s13 = scalar_lea.hbm %s1928_s10, 16 }
  0xbc   :  { %p1385_p10 = scmp.ne.s32.totalorder %s1928_s10, %s1384_s13  ;;  %p1388_p11 = scmp.lt.u32.totalorder %s1384_s13, %s1928_s10 }
  0xbe   :  { %p1390_p12 = pnand %p1388_p11, %p1385_p10 }
  0xc0   :  { %1393 = shalt.err (!%p1390_p12)
}
  0xc1   :  { %s1394_s8 = scalar_lea.vmem %s111_s15, 16  ;;  %s1398_s24 = scalar_lea.vmem %s111_s15, 32 }
  0xc2   :  { %p1395_p13 = scmp.ne.s32.totalorder %s111_s15, %s1394_s8  ;;  %p1399_p0 = scmp.lt.s32.totalorder %s111_s15, %s111_s15 }
  0xc3   :  { %p1400_p1 = scmp.lt.s32.totalorder %s1398_s24, %s1394_s8 }
  0xc5   :  { %p1401_p2 = por %p1400_p1, %p1399_p0 }
  0xc7   :  { %p1402_p3 = pnand %p1401_p2, %p1395_p13 }
  0xc9   :  { %1405 = shalt.err (!%p1402_p3)
}
  0xca   :  { %113 = dma.hbm_to_vmem [thread:$0]  %s1928_s10, 16, %s111_s15, [#allocation11]  }
  0xcb   :  { %s1406_s2 = scalar_lea.hbm %s1930_s12, 16 }
  0xcc   :  { %p1407_p4 = scmp.ne.s32.totalorder %s1930_s12, %s1406_s2  ;;  %p1410_p5 = scmp.lt.u32.totalorder %s1406_s2, %s1930_s12 }
  0xce   :  { %p1412_p6 = pnand %p1410_p5, %p1407_p4 }
  0xd0   :  { %1415 = shalt.err (!%p1412_p6)
}
  0xd1   :  { %s1416_s6 = scalar_lea.vmem %s131_s30, 16  ;;  %s1420_s27 = scalar_lea.vmem %s131_s30, 32 }
  0xd2   :  { %p1417_p7 = scmp.ne.s32.totalorder %s131_s30, %s1416_s6  ;;  %p1421_p8 = scmp.lt.s32.totalorder %s131_s30, %s131_s30 }
  0xd3   :  { %p1422_p9 = scmp.lt.s32.totalorder %s1420_s27, %s1416_s6 }
  0xd5   :  { %p1423_p10 = por %p1422_p9, %p1421_p8 }
  0xd7   :  { %p1424_p11 = pnand %p1423_p10, %p1417_p7 }
  0xd9   :  { %1427 = shalt.err (!%p1424_p11)
}
  0xda   :  { %133 = dma.hbm_to_vmem [thread:$0]  %s1930_s12, 16, %s131_s30, [#allocation14]  }
  0xdb   :  { %s1524_s15 = smov [#allocation18]   ;;  %s1525_s26 = smov [#allocation21]  }
  0xdc   :  { %s152_s4 = sshll.u32 %s1524_s15, 4  ;;  %s172_s28 = sshll.u32 %s1525_s26, 4  ;;  %s153_s4 = int_to_ptr.vmem [resolvable:$true] %s152_s4  ;;  %s173_s28 = int_to_ptr.vmem [resolvable:$true] %s172_s28 }
  0xdd   :  { %s1428_s25 = scalar_lea.hbm %s1932_s14, 16 }
  0xde   :  { %p1429_p12 = scmp.ne.s32.totalorder %s1932_s14, %s1428_s25  ;;  %p1432_p13 = scmp.lt.u32.totalorder %s1428_s25, %s1932_s14 }
  0xe0   :  { %p1434_p0 = pnand %p1432_p13, %p1429_p12 }
  0xe2   :  { %1437 = shalt.err (!%p1434_p0)
}
  0xe3   :  { %s1438_s12 = scalar_lea.vmem %s153_s4, 16  ;;  %s1442_s30 = scalar_lea.vmem %s153_s4, 32 }
  0xe4   :  { %p1439_p1 = scmp.ne.s32.totalorder %s153_s4, %s1438_s12  ;;  %p1443_p2 = scmp.lt.s32.totalorder %s153_s4, %s153_s4 }
  0xe5   :  { %p1444_p3 = scmp.lt.s32.totalorder %s1442_s30, %s1438_s12 }
  0xe7   :  { %p1445_p4 = por %p1444_p3, %p1443_p2 }
  0xe9   :  { %p1446_p5 = pnand %p1445_p4, %p1439_p1 }
  0xeb   :  { %1449 = shalt.err (!%p1446_p5)
}
  0xec   :  { %155 = dma.hbm_to_vmem [thread:$0]  %s1932_s14, 16, %s153_s4, [#allocation17]  }
  0xed   :  { %s1450_s2 = scalar_lea.hbm %s1934_s16, 16 }
  0xee   :  { %p1451_p6 = scmp.ne.s32.totalorder %s1934_s16, %s1450_s2  ;;  %p1454_p7 = scmp.lt.u32.totalorder %s1450_s2, %s1934_s16 }
  0xf0   :  { %p1456_p8 = pnand %p1454_p7, %p1451_p6 }
  0xf2   :  { %1459 = shalt.err (!%p1456_p8)
}
  0xf3   :  { %s1460_s6 = scalar_lea.vmem %s173_s28, 16  ;;  %s1464_s27 = scalar_lea.vmem %s173_s28, 32 }
  0xf4   :  { %p1461_p9 = scmp.ne.s32.totalorder %s173_s28, %s1460_s6  ;;  %p1465_p10 = scmp.lt.s32.totalorder %s173_s28, %s173_s28 }
  0xf5   :  { %p1466_p11 = scmp.lt.s32.totalorder %s1464_s27, %s1460_s6 }
  0xf7   :  { %p1467_p12 = por %p1466_p11, %p1465_p10 }
  0xf9   :  { %p1468_p13 = pnand %p1467_p12, %p1461_p9 }
  0xfb   :  { %1471 = shalt.err (!%p1468_p13)
}
  0xfc   :  { %175 = dma.hbm_to_vmem [thread:$0]  %s1934_s16, 16, %s173_s28, [#allocation20]  }
  0xfd   :  { %s1526_s3 = smov [#allocation24]   ;;  %s1472_s13 = scalar_lea.hbm %s1936_s18, 16 }
  0xfe   :  { %s194_s15 = sshll.u32 %s1526_s3, 4  ;;  %p1473_p0 = scmp.ne.s32.totalorder %s1936_s18, %s1472_s13  ;;  %s195_s15 = int_to_ptr.vmem [resolvable:$true] %s194_s15 }
  0xff   :  { %p1476_p1 = scmp.lt.u32.totalorder %s1472_s13, %s1936_s18 }
 0x101   :  { %p1478_p2 = pnand %p1476_p1, %p1473_p0 }
 0x103   :  { %1481 = shalt.err (!%p1478_p2)
}
 0x104   :  { %s1482_s8 = scalar_lea.vmem %s195_s15, 16  ;;  %s1486_s16 = scalar_lea.vmem %s195_s15, 32 }
 0x105   :  { %p1483_p3 = scmp.ne.s32.totalorder %s195_s15, %s1482_s8  ;;  %p1487_p4 = scmp.lt.s32.totalorder %s195_s15, %s195_s15 }
 0x106   :  { %p1488_p5 = scmp.lt.s32.totalorder %s1486_s16, %s1482_s8 }
 0x108   :  { %p1489_p6 = por %p1488_p5, %p1487_p4 }
 0x10a   :  { %p1490_p7 = pnand %p1489_p6, %p1483_p3 }
 0x10c   :  { %1493 = shalt.err (!%p1490_p7)
}
 0x10d   :  { %197 = dma.hbm_to_vmem [thread:$0]  %s1936_s18, 16, %s195_s15, [#allocation23]  }
 0x10e   :  { %1494 = dma.done.wait [#allocation3], 512  }
 0x10f   :  { %1495 = vsyncadd [#allocation3], 4294966784 }
 0x110   :  { %1496 = dma.done.wait [#allocation5], 32  }
 0x111   :  { %1497 = vsyncadd [#allocation5], 4294967264 }
 0x112   :  { %1498 = dma.done.wait [#allocation8], 32  }
 0x113   :  { %1499 = vsyncadd [#allocation8], 4294967264 }
 0x114   :  { %1500 = dma.done.wait [#allocation11], 1040  }
 0x115   :  { %1501 = vsyncadd [#allocation11], 4294966256 }
 0x116   :  { %1502 = dma.done.wait [#allocation14], 32  }
 0x117   :  { %1503 = vsyncadd [#allocation14], 4294967264 }
 0x118   :  { %1504 = dma.done.wait [#allocation17], 1040  }
 0x119   :  { %1505 = vsyncadd [#allocation17], 4294966256 }
 0x11a   :  { %1506 = dma.done.wait [#allocation20], 32  }
 0x11b   :  { %1507 = vsyncadd [#allocation20], 4294967264 }
 0x11c   :  { %1508 = dma.done.wait [#allocation23], 1040  }
 0x11d   :  { %1509 = vsyncadd [#allocation23], 4294966256  ;;  %v1527_v0 = vmov 0.0   ;;  %vm1528_vm0 = vmmov 0   ;;  %v1120_v1 = vld [vmem:[#allocation2] sm:$0xff]   ;;  %v1121_v2 = vld [vmem:[#allocation2 + $0x8] sm:$0xff]  }
 0x11e   :  { %1009 = vmatprep.subr.bf16.mxu0 %v1527_v0  ;;  %1017 = vmatprep.mubr.msk.bf16.mxu0 %vm1528_vm0, %v1527_v0  ;;  %v1122_v3 = vld [vmem:[#allocation2 + $0x10] sm:$0xff]   ;;  %vm284_vm1 = vcmask 523264   ;;  %v1123_v4 = vld [vmem:[#allocation2 + $0x18] sm:$0xff]   ;;  %s1944_s30 = sld [smem:[#allocation33_spill]]  ;;  %v1124_v6 = vld [vmem:[%s1923_s5] sm:$0xff]   ;;  %s1945_s2 = sld [smem:[#allocation35_spill]] }
 0x11f   :  { %1021 = vmatprep.subr.bf16.mxu1 %v1527_v0  ;;  %1037 = vmatprep.mubr.msk.bf16.mxu1 %vm1528_vm0, %v1527_v0  ;;  %v1125_v16 = vld [vmem:[%s1923_s5 + $0x8] sm:$0xff]   ;;  %v1126_v17 = vld [vmem:[%s1923_s5 + $0x10] sm:$0xff]   ;;  %v1127_v18 = vld [vmem:[%s1923_s5 + $0x18] sm:$0xff]   ;;  %s1946_s0 = sld [smem:[#allocation36_spill]] }
 0x120   :  { %1010 = vmatpush3.bf16.msra.mxu0 %v1120_v1  ;;  %1022 = vmatpush3.bf16.msra.mxu1 %v1124_v6  ;;  %v1128_v19 = vld [vmem:[%s1923_s5 + $0x20] sm:$0xff]   ;;  %v1129_v20 = vld [vmem:[%s1923_s5 + $0x28] sm:$0xff]   ;;  %v1130_v21 = vld [vmem:[%s1923_s5 + $0x30] sm:$0xff]  }
 0x121   :  { %1011 = vmatprep.subr.bf16.mxu0 %v1527_v0  ;;  %1023 = vmatprep.subr.bf16.mxu1 %v1527_v0  ;;  %v1131_v22 = vld [vmem:[%s1923_s5 + $0x38] sm:$0xff]   ;;  %v925_v34 = vld [vmem:[#allocation4] ss:$0 sm:$0xff]  ;;  %v1132_v38 = vld [vmem:[#allocation10] sm:$0xff]  }
 0x122   :  { %v926_v39 = vld [vmem:[#allocation6] ss:$0 sm:$0xff]  ;;  %v1133_v48 = vld [vmem:[#allocation10 + $0x8] sm:$0xff]   ;;  %v1134_v49 = vld [vmem:[#allocation10 + $0x10] sm:$0xff]  }
 0x123   :  { %v1135_v50 = vld [vmem:[#allocation10 + $0x18] sm:$0xff]   ;;  %v1136_v51 = vld [vmem:[#allocation10 + $0x20] sm:$0xff]   ;;  %v1137_v52 = vld [vmem:[#allocation10 + $0x28] sm:$0xff]  }
 0x124   :  { %1012 = vmatpush3.bf16.msra.mxu0 %v1121_v2  ;;  %v244_v5 = vld [vmem:[%s1944_s30] sm:$0xf]  ;;  %1024 = vmatpush3.bf16.msra.mxu1 %v1125_v16  ;;  %v1138_v53 = vld [vmem:[#allocation10 + $0x30] sm:$0xff]   ;;  %v935_v1 = vld [vmem:[#allocation7] ss:$0 sm:$0xff] }
 0x125   :  { %1013 = vmatprep.subr.bf16.mxu0 %v1527_v0  ;;  %v918_v7 = vld [vmem:[%s1945_s2] ss:$0 sm:$0xff]  ;;  %1025 = vmatprep.subr.bf16.mxu1 %v1527_v0 }
 0x126   :  { %v924_v32 = vld [vmem:[%s1946_s0] ss:$0 sm:$0xff] }
 0x127   :  { %v1139_v54 = vld [vmem:[#allocation10 + $0x38] sm:$0xff]  }
 0x128   :  { %1014 = vmatpush3.bf16.msra.mxu0 %v1122_v3  ;;  %1026 = vmatpush3.bf16.msra.mxu1 %v1126_v17  ;;  %v936_v3 = vld [vmem:[#allocation9] ss:$0 sm:$0xff]  ;;  %v1141_v17 = vld [vmem:[#allocation16 + $0x8] sm:$0xff]  }
 0x129   :  { %1015 = vmatprep.subr.bf16.mxu0 %v1527_v0  ;;  %1027 = vmatprep.subr.bf16.mxu1 %v1527_v0 }
 0x12c   :  { %1016 = vmatpush3.bf16.msra.mxu0 %v1123_v4  ;;  %1028 = vmatpush3.bf16.msra.mxu1 %v1127_v18  ;;  %v1142_v18 = vld [vmem:[#allocation16 + $0x10] sm:$0xff]  }
 0x12d   :  { %1041 = vmatprep.subr.bf16.mxu0 %v1527_v0  ;;  %1029 = vmatprep.subr.bf16.mxu1 %v1527_v0 }
 0x12f   :  { %1018 = vmatmul.mubr.msk.bf16.vlgmr.msra.gmra.mrb[0].mxu0 %vm284_vm1, %v244_v5 }
 0x130   :  { %1057 = vmatprep.mubr.msk.bf16.mxu0 %vm1528_vm0, %v1527_v0  ;;  %1030 = vmatpush3.bf16.msra.mxu1 %v1128_v19  ;;  %v1143_v19 = vld [vmem:[#allocation16 + $0x18] sm:$0xff]  }
 0x131   :  { %1031 = vmatprep.subr.bf16.mxu1 %v1527_v0  ;;  %1042 = vmatpush3.bf16.msra.mxu0 %v1132_v38 }
 0x132   :  { %1043 = vmatprep.subr.bf16.mxu0 %v1527_v0 }
 0x134   :  { %1032 = vmatpush3.bf16.msra.mxu1 %v1129_v20  ;;  %v1144_v20 = vld [vmem:[#allocation16 + $0x20] sm:$0xff]  }
 0x135   :  { %1033 = vmatprep.subr.bf16.mxu1 %v1527_v0  ;;  %1044 = vmatpush3.bf16.msra.mxu0 %v1133_v48 }
 0x136   :  { %1045 = vmatprep.subr.bf16.mxu0 %v1527_v0 }
 0x138   :  { %1034 = vmatpush3.bf16.msra.mxu1 %v1130_v21  ;;  %v1145_v21 = vld [vmem:[#allocation16 + $0x28] sm:$0xff]  }
 0x139   :  { %1035 = vmatprep.subr.bf16.mxu1 %v1527_v0  ;;  %1046 = vmatpush3.bf16.msra.mxu0 %v1134_v49  ;;  %v1149_v49 = vld [vmem:[#allocation22 + $0x8] sm:$0xff]  }
 0x13a   :  { %1047 = vmatprep.subr.bf16.mxu0 %v1527_v0 }
 0x13c   :  { %1036 = vmatpush3.bf16.msra.mxu1 %v1131_v22  ;;  %v1146_v22 = vld [vmem:[#allocation16 + $0x30] sm:$0xff]  }
 0x13d   :  { %1061 = vmatprep.subr.bf16.mxu1 %v1527_v0  ;;  %1048 = vmatpush3.bf16.msra.mxu0 %v1135_v50  ;;  %v1150_v50 = vld [vmem:[#allocation22 + $0x10] sm:$0xff]  }
 0x13e   :  { %1049 = vmatprep.subr.bf16.mxu0 %v1527_v0 }
 0x141   :  { %1050 = vmatpush3.bf16.msra.mxu0 %v1136_v51  ;;  %v1151_v51 = vld [vmem:[#allocation22 + $0x18] sm:$0xff]  }
 0x142   :  { %1051 = vmatprep.subr.bf16.mxu0 %v1527_v0 }
 0x145   :  { %1052 = vmatpush3.bf16.msra.mxu0 %v1137_v52  ;;  %v1152_v52 = vld [vmem:[#allocation22 + $0x20] sm:$0xff]  }
 0x146   :  { %1053 = vmatprep.subr.bf16.mxu0 %v1527_v0 }
 0x149   :  { %1054 = vmatpush3.bf16.msra.mxu0 %v1138_v53  ;;  %v1153_v53 = vld [vmem:[#allocation22 + $0x28] sm:$0xff]  }
 0x14a   :  { %1055 = vmatprep.subr.bf16.mxu0 %v1527_v0 }
 0x14d   :  { %1056 = vmatpush3.bf16.msra.mxu0 %v1139_v54  ;;  %v1154_v54 = vld [vmem:[#allocation22 + $0x30] sm:$0xff]  }
 0x14e   :  { %1081 = vmatprep.subr.bf16.mxu0 %v1527_v0 }
 0x202   :  { %v322_v8 = vpop.f32.mrb[0].mxu0 }
 0x203   :  { %v323_v9 = vadd.f32 %v918_v7, %v322_v8  ;;  %v1019_v10 = vpop.f32.mrb[1].mxu0  ;;  %v1140_v7 = vld [vmem:[#allocation16] sm:$0xff]   ;;  %v937_v8 = vld [vmem:[#allocation12] ss:$0 sm:$0xff] }
 0x204   :  { %v325_v11 = vpop.f32.mrb[2].mxu0 }
 0x205   :  { %v331_v12 = vmul.f32 0.1, %v323_v9  ;;  %v1020_v13 = vpop.f32.mrb[3].mxu0  ;;  %vm330_vm2 = vcmp.gt.f32.partialorder %v323_v9, 0.0 }
 0x207   :  { %v332_v14 = vsel %vm330_vm2, %v323_v9, %v331_v12 }
 0x208   :  { %333 = vadd.xlane.f32.xlu0 %v332_v14  ;;  %v337_v15 = vmul.f32 %v332_v14, %v332_v14 }
 0x20c   :  { %338 = vadd.xlane.f32.xlu0 %v337_v15 }
 0x295   :  { %v334_v23 = vpop.xlane.xlu0 %333 }
 0x296   :  { %v336_v24 = vmul.f32 0.0078125, %v334_v23  ;;  %v1147_v23 = vld [vmem:[#allocation16 + $0x38] sm:$0xff]  }
 0x298   :  { %v341_v26 = vmul.f32 %v336_v24, %v336_v24  ;;  %v343_v30 = vsub.f32 %v332_v14, %v336_v24 }
 0x299   :  { %v339_v25 = vpop.xlane.xlu0 %338 }
 0x29a   :  { %v340_v27 = vmul.f32 0.0078125, %v339_v25 }
 0x29c   :  { %v342_v28 = vsub.f32 %v340_v27, %v341_v26 }
 0x29e   :  { %v344_v29 = vadd.f32 1e-05, %v342_v28 }
 0x2a0   :  { %1156 = vrsqrt.f32 %v344_v29 }
 0x2aa   :  { %v1157_v31 = vpop.eup %1156 }
 0x2ab   :  { %v346_v33 = vmul.f32 %v1157_v31, %v343_v30 }
 0x2ad   :  { %v353_v35 = vmul.f32 %v924_v32, %v346_v33  ;;  %v946_v33 = vld [vmem:[#allocation13] ss:$0 sm:$0xff] }
 0x2af   :  { %v360_v36 = vadd.f32 %v925_v34, %v353_v35  ;;  %v947_v35 = vld [vmem:[#allocation15] ss:$0 sm:$0xff] }
 0x2b1   :  { %v361_v37 = vpack.c.bf16 %v360_v36, %v360_v36 }
 0x2b3   :  { %1038 = vmatmul.mubr.bf16.vlgmr.msra.gmra.mrb[0].mxu1 %v361_v37 }
 0x2b4   :  { %1077 = vmatprep.mubr.msk.bf16.mxu1 %vm1528_vm0, %v1527_v0  ;;  %1062 = vmatpush3.bf16.msra.mxu1 %v1140_v7 }
 0x2b5   :  { %1063 = vmatprep.subr.bf16.mxu1 %v1527_v0 }
 0x2b8   :  { %1064 = vmatpush3.bf16.msra.mxu1 %v1141_v17 }
 0x2b9   :  { %1065 = vmatprep.subr.bf16.mxu1 %v1527_v0 }
 0x2bc   :  { %1066 = vmatpush3.bf16.msra.mxu1 %v1142_v18 }
 0x2bd   :  { %1067 = vmatprep.subr.bf16.mxu1 %v1527_v0 }
 0x2c0   :  { %1068 = vmatpush3.bf16.msra.mxu1 %v1143_v19 }
 0x2c1   :  { %1069 = vmatprep.subr.bf16.mxu1 %v1527_v0 }
 0x2c4   :  { %1070 = vmatpush3.bf16.msra.mxu1 %v1144_v20 }
 0x2c5   :  { %1071 = vmatprep.subr.bf16.mxu1 %v1527_v0 }
 0x2c8   :  { %1072 = vmatpush3.bf16.msra.mxu1 %v1145_v21 }
 0x2c9   :  { %1073 = vmatprep.subr.bf16.mxu1 %v1527_v0 }
 0x2cc   :  { %1074 = vmatpush3.bf16.msra.mxu1 %v1146_v22 }
 0x2cd   :  { %1075 = vmatprep.subr.bf16.mxu1 %v1527_v0 }
 0x2d0   :  { %1076 = vmatpush3.bf16.msra.mxu1 %v1147_v23 }
 0x386   :  { %v467_v40 = vpop.f32.mrb[0].mxu1 }
 0x387   :  { %v468_v41 = vadd.f32 %v926_v39, %v467_v40  ;;  %v1039_v42 = vpop.f32.mrb[1].mxu1  ;;  %v1148_v39 = vld [vmem:[#allocation22] sm:$0xff]   ;;  %v948_v40 = vld [vmem:[#allocation18] ss:$0 sm:$0xff] }
 0x388   :  { %v470_v43 = vpop.f32.mrb[2].mxu1 }
 0x389   :  { %v476_v44 = vmul.f32 0.1, %v468_v41  ;;  %v1040_v45 = vpop.f32.mrb[3].mxu1  ;;  %vm475_vm3 = vcmp.gt.f32.partialorder %v468_v41, 0.0 }
 0x38b   :  { %v477_v46 = vsel %vm475_vm3, %v468_v41, %v476_v44 }
 0x38c   :  { %478 = vadd.xlane.f32.xlu1 %v477_v46  ;;  %v481_v47 = vmul.f32 %v477_v46, %v477_v46 }
 0x390   :  { %482 = vadd.xlane.f32.xlu1 %v481_v47 }
 0x419   :  { %v479_v55 = vpop.xlane.xlu1 %478 }
 0x41a   :  { %v480_v56 = vmul.f32 0.0078125, %v479_v55  ;;  %v1155_v55 = vld [vmem:[#allocation22 + $0x38] sm:$0xff]  }
 0x41c   :  { %v485_v58 = vmul.f32 %v480_v56, %v480_v56  ;;  %v487_v62 = vsub.f32 %v477_v46, %v480_v56 }
 0x41d   :  { %v483_v57 = vpop.xlane.xlu1 %482 }
 0x41e   :  { %v484_v59 = vmul.f32 0.0078125, %v483_v57 }
 0x420   :  { %v486_v60 = vsub.f32 %v484_v59, %v485_v58 }
 0x422   :  { %v488_v61 = vadd.f32 1e-05, %v486_v60 }
 0x424   :  { %1158 = vrsqrt.f32 %v488_v61 }
 0x42e   :  { %v1159_v63 = vpop.eup %1158 }
 0x42f   :  { %v490_v2 = vmul.f32 %v1159_v63, %v487_v62 }
 0x431   :  { %v497_v4 = vmul.f32 %v935_v1, %v490_v2  ;;  %v957_v2 = vld [vmem:[#allocation19] ss:$0 sm:$0xff] }
 0x433   :  { %v504_v5 = vadd.f32 %v936_v3, %v497_v4  ;;  %v958_v4 = vld [vmem:[#allocation21] ss:$0 sm:$0xff] }
 0x435   :  { %v505_v6 = vpack.c.bf16 %v504_v5, %v504_v5 }
 0x437   :  { %1058 = vmatmul.mubr.bf16.vlgmr.msra.gmra.mrb[4].mxu0 %v505_v6 }
 0x438   :  { %1097 = vmatprep.mubr.msk.bf16.mxu0 %vm1528_vm0, %v1527_v0  ;;  %1082 = vmatpush3.bf16.msra.mxu0 %v1148_v39 }
 0x439   :  { %1083 = vmatprep.subr.bf16.mxu0 %v1527_v0 }
 0x43c   :  { %1084 = vmatpush3.bf16.msra.mxu0 %v1149_v49 }
 0x43d   :  { %1085 = vmatprep.subr.bf16.mxu0 %v1527_v0 }
 0x440   :  { %1086 = vmatpush3.bf16.msra.mxu0 %v1150_v50 }
 0x441   :  { %1087 = vmatprep.subr.bf16.mxu0 %v1527_v0 }
 0x444   :  { %1088 = vmatpush3.bf16.msra.mxu0 %v1151_v51 }
 0x445   :  { %1089 = vmatprep.subr.bf16.mxu0 %v1527_v0 }
 0x448   :  { %1090 = vmatpush3.bf16.msra.mxu0 %v1152_v52 }
 0x449   :  { %1091 = vmatprep.subr.bf16.mxu0 %v1527_v0 }
 0x44c   :  { %1092 = vmatpush3.bf16.msra.mxu0 %v1153_v53 }
 0x44d   :  { %1093 = vmatprep.subr.bf16.mxu0 %v1527_v0 }
 0x450   :  { %1094 = vmatpush3.bf16.msra.mxu0 %v1154_v54 }
 0x451   :  { %1095 = vmatprep.subr.bf16.mxu0 %v1527_v0 }
 0x454   :  { %1096 = vmatpush3.bf16.msra.mxu0 %v1155_v55 }
 0x50a   :  { %v611_v9 = vpop.f32.mrb[4].mxu0 }
 0x50b   :  { %v612_v10 = vadd.f32 %v937_v8, %v611_v9  ;;  %v1059_v11 = vpop.f32.mrb[5].mxu0  ;;  %v959_v8 = vld [vmem:[#allocation24] ss:$0 sm:$0xff] }
 0x50c   :  { %v614_v12 = vpop.f32.mrb[6].mxu0 }
 0x50d   :  { %v620_v13 = vmul.f32 0.1, %v612_v10  ;;  %v1060_v14 = vpop.f32.mrb[7].mxu0  ;;  %vm619_vm4 = vcmp.gt.f32.partialorder %v612_v10, 0.0 }
 0x50f   :  { %v621_v15 = vsel %vm619_vm4, %v612_v10, %v620_v13 }
 0x510   :  { %622 = vadd.xlane.f32.xlu0 %v621_v15  ;;  %v625_v16 = vmul.f32 %v621_v15, %v621_v15 }
 0x512   :  { %626 = vadd.xlane.f32.xlu1 %v625_v16 }
 0x59d   :  { %v623_v24 = vpop.xlane.xlu0 %622 }
 0x59e   :  { %v624_v25 = vmul.f32 0.0078125, %v623_v24 }
 0x59f   :  { %v627_v26 = vpop.xlane.xlu1 %626 }
 0x5a0   :  { %v629_v27 = vmul.f32 %v624_v25, %v624_v25  ;;  %v628_v28 = vmul.f32 0.0078125, %v627_v26  ;;  %v631_v31 = vsub.f32 %v621_v15, %v624_v25 }
 0x5a2   :  { %v630_v29 = vsub.f32 %v628_v28, %v629_v27 }
 0x5a4   :  { %v632_v30 = vadd.f32 1e-05, %v630_v29 }
 0x5a6   :  { %1160 = vrsqrt.f32 %v632_v30 }
 0x5b0   :  { %v1161_v32 = vpop.eup %1160 }
 0x5b1   :  { %v634_v34 = vmul.f32 %v1161_v32, %v631_v31 }
 0x5b3   :  { %v641_v36 = vmul.f32 %v946_v33, %v634_v34 }
 0x5b5   :  { %v648_v37 = vadd.f32 %v947_v35, %v641_v36 }
 0x5b7   :  { %v649_v38 = vpack.c.bf16 %v648_v37, %v648_v37 }
 0x5b9   :  { %1078 = vmatmul.mubr.bf16.vlgmr.msra.gmra.mrb[4].mxu1 %v649_v38 }
 0x68c   :  { %v755_v41 = vpop.f32.mrb[4].mxu1 }
 0x68d   :  { %v756_v42 = vadd.f32 %v948_v40, %v755_v41  ;;  %v1079_v43 = vpop.f32.mrb[5].mxu1 }
 0x68e   :  { %v758_v44 = vpop.f32.mrb[6].mxu1 }
 0x68f   :  { %v764_v45 = vmul.f32 0.1, %v756_v42  ;;  %v1080_v46 = vpop.f32.mrb[7].mxu1  ;;  %vm763_vm5 = vcmp.gt.f32.partialorder %v756_v42, 0.0 }
 0x691   :  { %v765_v47 = vsel %vm763_vm5, %v756_v42, %v764_v45 }
 0x692   :  { %766 = vadd.xlane.f32.xlu0 %v765_v47  ;;  %v769_v48 = vmul.f32 %v765_v47, %v765_v47 }
 0x694   :  { %770 = vadd.xlane.f32.xlu1 %v769_v48 }
 0x71f   :  { %v767_v56 = vpop.xlane.xlu0 %766 }
 0x720   :  { %v768_v57 = vmul.f32 0.0078125, %v767_v56 }
 0x721   :  { %v771_v58 = vpop.xlane.xlu1 %770 }
 0x722   :  { %v773_v59 = vmul.f32 %v768_v57, %v768_v57  ;;  %v772_v60 = vmul.f32 0.0078125, %v771_v58  ;;  %v775_v63 = vsub.f32 %v765_v47, %v768_v57 }
 0x724   :  { %v774_v61 = vsub.f32 %v772_v60, %v773_v59 }
 0x726   :  { %v776_v62 = vadd.f32 1e-05, %v774_v61 }
 0x728   :  { %1162 = vrsqrt.f32 %v776_v62 }
 0x732   :  { %v1163_v1 = vpop.eup %1162 }
 0x733   :  { %v778_v3 = vmul.f32 %v1163_v1, %v775_v63 }
 0x735   :  { %v785_v5 = vmul.f32 %v957_v2, %v778_v3 }
 0x737   :  { %v792_v6 = vadd.f32 %v958_v4, %v785_v5 }
 0x739   :  { %v793_v7 = vpack.c.bf16 %v792_v6, %v792_v6 }
 0x73b   :  { %1098 = vmatmul.mubr.bf16.vlgmr.msra.gmra.mrb[8].mxu0 %v793_v7 }
 0x80e   :  { %v899_v0 = vpop.f32.mrb[8].mxu0 }
 0x80f   :  { %v900_v9 = vadd.f32 %v959_v8, %v899_v0  ;;  %v1099_v10 = vpop.f32.mrb[9].mxu0 }
 0x810   :  { %v902_v11 = vpop.f32.mrb[10].mxu0 }
 0x811   :  { %905 = vst [vmem:[%s1937_s19] sm:$0xff] %v900_v9  ;;  %v1100_v12 = vpop.f32.mrb[11].mxu0 }
 0x812   :  { %910 = vsyncpa [#allocation3], 1 }
 0x813   :  { %911 = vsyncpa [#allocation5], 1 }
 0x814   :  { %912 = vsyncpa [#allocation8], 1 }
 0x815   :  { %913 = vsyncpa [#allocation11], 1 }
 0x816   :  { %914 = vsyncpa [#allocation14], 1 }
 0x817   :  { %915 = vsyncpa [#allocation17], 1 }
 0x818   :  { %916 = vsyncpa [#allocation20], 1 }
 0x819   :  { %917 = vsyncpa [#allocation23], 1 }

</bundles_post_ra>
